<compile_context>
chip_gen: v7x
topology: tpu7x:2x2x1
jax: 0.10.0
libtpu: 0.0.40
codegen_flags: <defaults>
</compile_context>

<pallas_src>
import functools

import jax
import jax.numpy as jnp
from jax import lax
from jax.experimental import pallas as pl
from jax.experimental.pallas import tpu as pltpu


# ----------------------------- small utilities ------------------------------

def _round_up(x, m):
    return (x + m - 1) // m * m


def _tpu_generation():
    """Best-effort chip query: (vmem_capacity_bytes, num_tensorcores, k_aligns, is_v5e)."""
    kind = ""
    try:
        kind = jax.devices()[0].device_kind.lower()
    except Exception:
        pass
    if "v7" in kind:
        vmem, cores, k_aligns = 64 << 20, 2, (256, 128)
    elif "v6" in kind:
        vmem, cores, k_aligns = 128 << 20, 1, (256, 128)
    elif "v5" in kind:
        vmem, cores, k_aligns = 128 << 20, 1, (128,)
    else:  # unknown generation: conservative VMEM, wide-MXU-friendly alignment
        vmem, cores, k_aligns = 64 << 20, 1, (256, 128)
    try:  # prefer the authoritative capacity when the query is available
        vmem = int(pltpu.get_tpu_info().vmem_capacity_bytes)
    except Exception:
        pass
    is_v5e = ("v5e" in kind) or ("v5 lite" in kind) or ("v5lite" in kind)
    return vmem, cores, k_aligns, is_v5e


def _block_spec(shape, index_map, buffer_count):
    """BlockSpec with optional deeper pipelining for the streamed operand."""
    if buffer_count != 2:
        try:
            return pl.BlockSpec(shape, index_map,
                                pipeline_mode=pl.Buffered(buffer_count))
        except TypeError:  # older JAX without pipeline_mode: default double buffer
            pass
    return pl.BlockSpec(shape, index_map)


# ----------------------------- tile selection -------------------------------

def _pick_head_group(head_num, head_dim, target_n=512):
    """Heads per grid step: G*head_dim lane-aligned (multiple of 128), ~target_n."""
    best_under, smallest_over = None, None
    for g in range(1, head_num + 1):
        if head_num % g or (g * head_dim) % 128:
            continue
        if g * head_dim <= target_n:
            best_under = g
        elif smallest_over is None:
            smallest_over = g
    if best_under is not None:
        return best_under
    if smallest_over is not None:
        return smallest_over
    return head_num  # no lane-aligned grouping: full out_features block (always legal)


def _divisor_candidates(dim, aligns, cap):
    """Descending block-size candidates: full dim first (when <= cap), then aligned
    divisors (preferred alignments first), full dim as an always-legal last resort."""
    cands = []
    if dim <= cap:
        cands.append(dim)
    for align in aligns:
        divs = [d for d in range(align, min(dim, cap) + 1, align) if dim % d == 0]
        cands.extend(sorted(divs, reverse=True))
    if dim not in cands:
        # TODO(synk): pathological dims (huge, no aligned divisor) deserve a masked
        # remainder / wrapper-padding path instead of a full-extent block.
        cands.append(dim)
    seen, ordered = set(), []
    for c in cands:
        if c not in seen:
            seen.add(c)
            ordered.append(c)
    return ordered


def _footprint_bytes(TS, TK, G, head_dim, num_k, x_item, w_item, out_item,
                     x_bufs, w_bufs, sub_x, sub_w):
    """Estimated VMEM bytes: pipelined operand/output blocks + accumulator scratch.
    Output last dim (head_dim) is lane-padded to 128 in VMEM."""
    TN = G * head_dim
    x_blk = _round_up(TS, sub_x) * _round_up(TK, 128) * x_item
    w_blk = _round_up(TN, sub_w) * _round_up(TK, 128) * w_item
    b_blk = sub_w * _round_up(TN, 128) * w_item
    o_blk = G * _round_up(TS, sub_x) * _round_up(head_dim, 128) * out_item
    acc = _round_up(TS, 8) * _round_up(TN, 128) * 4 if num_k > 1 else 0
    return x_bufs * x_blk + w_bufs * w_blk + 2 * (b_blk + o_blk) + acc


def _choose_tiles(S, K, G, head_dim, x_item, w_item, out_item, budget,
                  k_aligns, sub_x, sub_w, deep_buffer):
    """Pick (TS, TK): prefer the largest TK (full K if possible -> num_k == 1 so
    the resident-operand ordering is real), then the largest TS (<= ~1024) that
    keeps the double-buffered footprint within the VMEM budget."""
    ts_cands = _divisor_candidates(S, (sub_x,), cap=1024)
    tk_cands = _divisor_candidates(K, k_aligns, cap=K)
    bufs = 3 if deep_buffer else 2  # conservatively count the deeper v5e buffer
    for TK in tk_cands:
        num_k = K // TK
        for TS in ts_cands:
            fp = _footprint_bytes(TS, TK, G, head_dim, num_k, x_item, w_item,
                                  out_item, bufs, bufs, sub_x, sub_w)
            if fp <= budget:
                return TS, TK
    # Nothing fits the budget (pathological shapes): smallest candidates; the
    # vmem_limit below is raised toward physical capacity minus headroom.
    return min(ts_cands), min(tk_cands)


# --------------------------------- kernel -----------------------------------

def _linear_transpose_kernel(x_ref, w_ref, b_ref, o_ref, *scratch,
                             head_group, head_dim, single_k):
    # x_ref:  (1, TS, TK)    activation tile for batch b / seq tile s
    # w_ref:  (TN, TK)       weight tile, native (out, in) layout (TN = G*D)
    # b_ref:  (1, TN)        bias slice for this head group
    # o_ref:  (1, G, TS, D)  output block at [b, head_group, s_tile, :]
    # scratch: () in the num_k==1 fast path, (acc_ref,) otherwise.
    #
    # (TS, TK) . (TN, TK)^T -> (TS, TN) on the MXU; the transposed-RHS
    # contraction keeps the weight in its checkpoint layout (no wrapper copy).
    partial = lax.dot_general(
        x_ref[0], w_ref[...],
        (((1,), (1,)), ((), ())),
        preferred_element_type=jnp.float32,
    )

    def store_heads(head_slice):
        # Per-head fused bias-add + cast + store: live range is (TS, D) instead
        # of (TS, TN) -> bounded vreg pressure (v5e has a single vst slot).
        # Static unroll with static, lane-contiguous slices.
        bias_f32 = b_ref[...].astype(jnp.float32)           # (1, TN)
        for g in range(head_group):
            lo = g * head_dim
            o_ref[0, g] = (head_slice(lo) +
                           bias_f32[:, lo:lo + head_dim]).astype(o_ref.dtype)

    if single_k:
        # Fast path (num_k == 1): no accumulator scratch, no init/finalize RMW.
        store_heads(lambda lo: partial[:, lo:lo + head_dim])
    else:
        acc_ref, = scratch
        k = pl.program_id(3)

        @pl.when(k == 0)
        def _init():
            acc_ref[...] = partial

        @pl.when(k != 0)
        def _accumulate():
            acc_ref[...] = acc_ref[...] + partial

        @pl.when(k == pl.num_programs(3) - 1)
        def _finalize():
            store_heads(lambda lo: acc_ref[:, lo:lo + head_dim])


# --------------------------------- wrapper ----------------------------------

def column_parallel_linear_transpose(x, weight, bias, head_num, *,
                                     n_tile_target=512):
    """x: (B, S, in_features); weight: (out_features, in_features); bias: (out_features,).

    Returns (B, head_num, S, head_dim), head_dim = out_features // head_num.
    Equivalent to (x @ weight.T + bias).reshape(B, S, H, D).transpose(0, 2, 1, 3).
    """
    B, S, in_features = x.shape
    out_features, in_features_w = weight.shape
    assert in_features_w == in_features, (weight.shape, x.shape)
    assert out_features % head_num == 0, (out_features, head_num)
    head_dim = out_features // head_num

    x_item = jnp.dtype(x.dtype).itemsize
    w_item = jnp.dtype(weight.dtype).itemsize
    out_item = x_item
    sub_x = max(8, 32 // x_item)     # sublane tile: 8 f32 / 16 bf16 / 32 int8
    sub_w = max(8, 32 // w_item)

    vmem_capacity, num_cores, k_aligns, is_v5e = _tpu_generation()
    budget = (vmem_capacity * 4) // 5        # ~80%: ~51 MiB v7x, ~102 MiB v5e/v6e

    G = _pick_head_group(head_num, head_dim, n_tile_target)
    TN = G * head_dim
    TS, TK = _choose_tiles(S, in_features, G, head_dim, x_item, w_item, out_item,
                           budget, k_aligns, sub_x, sub_w, deep_buffer=is_v5e)

    num_s = S // TS
    num_k = in_features // TK
    num_n = head_num // G
    single_k = (num_k == 1)

    x_bytes = B * S * in_features * x_item
    w_bytes = out_features * in_features * w_item
    b_bytes = out_features * w_item
    out_bytes = B * out_features * S * out_item

    # Grid order: revisit-residency only exists when num_k == 1 (with num_k > 1 the
    # k axis changes both operands' block index every step, so both stream the same
    # bytes under either ordering). Fold num_cores in: on v7x megacore the resident
    # operand is fetched (up to) once per TensorCore.
    if single_k:
        weight_outer_cost = x_bytes * num_n + w_bytes * num_cores
        act_outer_cost = x_bytes * num_cores + w_bytes * (B * num_s)
        weight_stationary = weight_outer_cost <= act_outer_cost
        streamed = min(weight_outer_cost, act_outer_cost)
    else:
        weight_stationary = True   # arbitrary: identical streamed bytes either way
        streamed = x_bytes * num_n + w_bytes * (B * num_s)

    if weight_stationary:
        grid = (num_n, B, num_s, num_k)
        x_map = lambda n, b, s, k: (b, s, k)
        w_map = lambda n, b, s, k: (n, k)
        b_map = lambda n, b, s, k: (0, n)
        o_map = lambda n, b, s, k: (b, n, s, 0)
        x_bufs, w_bufs = (3 if is_v5e else 2), 2    # x is the streamed operand
    else:
        grid = (B, num_s, num_n, num_k)
        x_map = lambda b, s, n, k: (b, s, k)
        w_map = lambda b, s, n, k: (n, k)
        b_map = lambda b, s, n, k: (0, n)
        o_map = lambda b, s, n, k: (b, n, s, 0)
        x_bufs, w_bufs = 2, (3 if is_v5e else 2)    # weight is the streamed operand

    bias2d = bias.reshape(1, out_features)  # negligible; avoids 1-D lane layout

    kernel = functools.partial(_linear_transpose_kernel, head_group=G,
                               head_dim=head_dim, single_k=single_k)

    scratch_shapes = [] if single_k else [pltpu.VMEM((TS, TN), jnp.float32)]

    # VMEM limit: actual pipelined footprint + headroom for Mosaic internal
    # scratch/semaphores; never the full physical capacity (esp. v7x 64 MiB).
    footprint = _footprint_bytes(TS, TK, G, head_dim, num_k, x_item, w_item,
                                 out_item, x_bufs, w_bufs, sub_x, sub_w)
    vmem_limit = int(min(vmem_capacity - (8 << 20),
                         max(footprint + (4 << 20), 32 << 20)))

    cost = pl.CostEstimate(
        flops=2 * B * S * in_features * out_features,
        transcendentals=0,
        bytes_accessed=int(streamed + b_bytes + out_bytes),
    )

    return pl.pallas_call(
        kernel,
        out_shape=jax.ShapeDtypeStruct((B, head_num, S, head_dim), x.dtype),
        grid_spec=pltpu.PrefetchScalarGridSpec(
            num_scalar_prefetch=0,
            grid=grid,
            in_specs=[
                _block_spec((1, TS, TK), x_map, x_bufs),   # activation tile
                _block_spec((TN, TK), w_map, w_bufs),      # weight tile (native layout)
                pl.BlockSpec((1, TN), b_map),              # bias slice
            ],
            out_specs=pl.BlockSpec((1, G, TS, head_dim), o_map),
            scratch_shapes=scratch_shapes,
        ),
        compiler_params=pltpu.CompilerParams(
            dimension_semantics=("parallel", "parallel", "parallel", "arbitrary"),
            vmem_limit_bytes=vmem_limit,
        ),
        cost_estimate=cost,
    )(x, weight, bias2d)


# ------------------------------- reference ----------------------------------

def _reference(x, weight, bias, head_num):
    B, S, _ = x.shape
    out_features = weight.shape[0]
    head_dim = out_features // head_num
    lin = x @ weight.T + bias
    lin = lin.reshape(B, S, head_num, head_dim)
    return jnp.transpose(lin, (0, 2, 1, 3))


if __name__ == "__main__":
    # Small shapes consistent with the module (model_parallel_size = 1):
    B, S = 2, 8
    in_features = 32
    out_features = 32
    head_num = 4
    initializer_range = 0.02

    key = jax.random.PRNGKey(0)
    kx, kw = jax.random.split(key)

    x = jax.random.normal(kx, (B, S, in_features), dtype=jnp.float32)
    # Deterministic parameter init matching nn.Module.__init__:
    # weight ~ N(0, initializer_range), bias = 0
    weight = initializer_range * jax.random.normal(
        kw, (out_features, in_features), dtype=jnp.float32
    )
    bias = jnp.zeros((out_features,), dtype=jnp.float32)

    out = column_parallel_linear_transpose(x, weight, bias, head_num)
    out = jax.block_until_ready(out)

    ref = _reference(x, weight, bias, head_num)
    assert out.shape == (B, head_num, S, out_features // head_num), out.shape
    assert jnp.allclose(out, ref, atol=1e-5, rtol=1e-5), "mismatch vs reference"

    print("KERNEL_OK")
</pallas_src>

<mosaic_0001>
module attributes {stable_mosaic.version = 11 : i64} {
  func.func @_linear_transpose_kernel(%arg0: i32, %arg1: i32, %arg2: i32, %arg3: i32, %arg4: memref<1x8x32xf32, #tpu.memory_space<vmem>>, %arg5: memref<32x32xf32, #tpu.memory_space<vmem>>, %arg6: memref<1x32xf32, #tpu.memory_space<vmem>>, %arg7: memref<1x4x8x8xf32, #tpu.memory_space<vmem>>) attributes {dimension_semantics = [#tpu.dimension_semantics<parallel>, #tpu.dimension_semantics<parallel>, #tpu.dimension_semantics<parallel>, #tpu.dimension_semantics<arbitrary>], iteration_bounds = array<i64: 1, 2, 1, 1>, scalar_prefetch = 0 : i64, scratch_operands = 0 : i64, tpu.core_type = #tpu.core_type<tc>, window_params = [{transform_indices = @transform_0, window_bounds = array<i64: 1, 8, 32>}, {transform_indices = @transform_1, window_bounds = array<i64: 32, 32>}, {transform_indices = @transform_2, window_bounds = array<i64: 1, 32>}, {transform_indices = @transform_3, window_bounds = array<i64: 1, 4, 8, 8>}]} {
    %c0 = arith.constant 0 : index
    %c0_0 = arith.constant 0 : index
    %c0_1 = arith.constant 0 : index
    %0 = vector.load %arg4[%c0, %c0_0, %c0_1] : memref<1x8x32xf32, #tpu.memory_space<vmem>>, vector<1x8x32xf32>
    %1 = vector.shape_cast %0 : vector<1x8x32xf32> to vector<8x32xf32>
    %c0_2 = arith.constant 0 : index
    %c0_3 = arith.constant 0 : index
    %2 = vector.load %arg5[%c0_2, %c0_3] : memref<32x32xf32, #tpu.memory_space<vmem>>, vector<32x32xf32>
    %cst = arith.constant dense<0.000000e+00> : vector<8x32xf32>
    %3 = tpu.matmul %1, %2, %cst {dimension_numbers = #tpu.dot_dimension_numbers<[1], [1], [0], [0], [0, 0, 1, 0], [], []>} : vector<8x32xf32>, vector<32x32xf32>, vector<8x32xf32> -> vector<8x32xf32>
    %c0_4 = arith.constant 0 : index
    %c0_5 = arith.constant 0 : index
    %4 = vector.load %arg6[%c0_4, %c0_5] : memref<1x32xf32, #tpu.memory_space<vmem>>, vector<1x32xf32>
    %5 = vector.extract_strided_slice %3 {offsets = [0, 0], sizes = [8, 8], strides = [1, 1]} : vector<8x32xf32> to vector<8x8xf32>
    %6 = vector.extract_strided_slice %4 {offsets = [0, 0], sizes = [1, 8], strides = [1, 1]} : vector<1x32xf32> to vector<1x8xf32>
    %7 = vector.broadcast %6 : vector<1x8xf32> to vector<8x8xf32>
    %8 = arith.addf %5, %7 : vector<8x8xf32>
    %c0_6 = arith.constant 0 : index
    %c0_7 = arith.constant 0 : index
    %c0_8 = arith.constant 0 : index
    %c0_9 = arith.constant 0 : index
    %9 = vector.load %arg7[%c0_6, %c0_7, %c0_8, %c0_9] : memref<1x4x8x8xf32, #tpu.memory_space<vmem>>, vector<1x1x8x8xf32>
    %10 = vector.shape_cast %9 : vector<1x1x8x8xf32> to vector<8x8xf32>
    %11 = vector.shape_cast %8 : vector<8x8xf32> to vector<1x1x8x8xf32>
    tpu.vector_store %arg7[%c0_6, %c0_7, %c0_8, %c0_9], %11 {strides = array<i32>} : memref<1x4x8x8xf32, #tpu.memory_space<vmem>>, vector<1x1x8x8xf32>,
    %12 = vector.extract_strided_slice %3 {offsets = [0, 8], sizes = [8, 8], strides = [1, 1]} : vector<8x32xf32> to vector<8x8xf32>
    %13 = vector.extract_strided_slice %4 {offsets = [0, 8], sizes = [1, 8], strides = [1, 1]} : vector<1x32xf32> to vector<1x8xf32>
    %14 = vector.broadcast %13 : vector<1x8xf32> to vector<8x8xf32>
    %15 = arith.addf %12, %14 : vector<8x8xf32>
    %c0_10 = arith.constant 0 : index
    %c1 = arith.constant 1 : index
    %c0_11 = arith.constant 0 : index
    %c0_12 = arith.constant 0 : index
    %16 = vector.load %arg7[%c0_10, %c1, %c0_11, %c0_12] : memref<1x4x8x8xf32, #tpu.memory_space<vmem>>, vector<1x1x8x8xf32>
    %17 = vector.shape_cast %16 : vector<1x1x8x8xf32> to vector<8x8xf32>
    %18 = vector.shape_cast %15 : vector<8x8xf32> to vector<1x1x8x8xf32>
    tpu.vector_store %arg7[%c0_10, %c1, %c0_11, %c0_12], %18 {strides = array<i32>} : memref<1x4x8x8xf32, #tpu.memory_space<vmem>>, vector<1x1x8x8xf32>,
    %19 = vector.extract_strided_slice %3 {offsets = [0, 16], sizes = [8, 8], strides = [1, 1]} : vector<8x32xf32> to vector<8x8xf32>
    %20 = vector.extract_strided_slice %4 {offsets = [0, 16], sizes = [1, 8], strides = [1, 1]} : vector<1x32xf32> to vector<1x8xf32>
    %21 = vector.broadcast %20 : vector<1x8xf32> to vector<8x8xf32>
    %22 = arith.addf %19, %21 : vector<8x8xf32>
    %c0_13 = arith.constant 0 : index
    %c2 = arith.constant 2 : index
    %c0_14 = arith.constant 0 : index
    %c0_15 = arith.constant 0 : index
    %23 = vector.load %arg7[%c0_13, %c2, %c0_14, %c0_15] : memref<1x4x8x8xf32, #tpu.memory_space<vmem>>, vector<1x1x8x8xf32>
    %24 = vector.shape_cast %23 : vector<1x1x8x8xf32> to vector<8x8xf32>
    %25 = vector.shape_cast %22 : vector<8x8xf32> to vector<1x1x8x8xf32>
    tpu.vector_store %arg7[%c0_13, %c2, %c0_14, %c0_15], %25 {strides = array<i32>} : memref<1x4x8x8xf32, #tpu.memory_space<vmem>>, vector<1x1x8x8xf32>,
    %26 = vector.extract_strided_slice %3 {offsets = [0, 24], sizes = [8, 8], strides = [1, 1]} : vector<8x32xf32> to vector<8x8xf32>
    %27 = vector.extract_strided_slice %4 {offsets = [0, 24], sizes = [1, 8], strides = [1, 1]} : vector<1x32xf32> to vector<1x8xf32>
    %28 = vector.broadcast %27 : vector<1x8xf32> to vector<8x8xf32>
    %29 = arith.addf %26, %28 : vector<8x8xf32>
    %c0_16 = arith.constant 0 : index
    %c3 = arith.constant 3 : index
    %c0_17 = arith.constant 0 : index
    %c0_18 = arith.constant 0 : index
    %30 = vector.load %arg7[%c0_16, %c3, %c0_17, %c0_18] : memref<1x4x8x8xf32, #tpu.memory_space<vmem>>, vector<1x1x8x8xf32>
    %31 = vector.shape_cast %30 : vector<1x1x8x8xf32> to vector<8x8xf32>
    %32 = vector.shape_cast %29 : vector<8x8xf32> to vector<1x1x8x8xf32>
    tpu.vector_store %arg7[%c0_16, %c3, %c0_17, %c0_18], %32 {strides = array<i32>} : memref<1x4x8x8xf32, #tpu.memory_space<vmem>>, vector<1x1x8x8xf32>,
    return
  }
  func.func @transform_0(%arg0: i32, %arg1: i32, %arg2: i32, %arg3: i32) -> (i32, i32, i32) {
    %c0_i32 = arith.constant 0 : i32
    return %arg1, %arg2, %arg3 : i32, i32, i32
  }
  func.func @transform_1(%arg0: i32, %arg1: i32, %arg2: i32, %arg3: i32) -> (i32, i32) {
    %c0_i32 = arith.constant 0 : i32
    return %arg0, %arg3 : i32, i32
  }
  func.func @transform_2(%arg0: i32, %arg1: i32, %arg2: i32, %arg3: i32) -> (i32, i32) {
    %c0_i32 = arith.constant 0 : i32
    %c0_i32_0 = arith.constant 0 : i32
    return %c0_i32, %arg0 : i32, i32
  }
  func.func @transform_3(%arg0: i32, %arg1: i32, %arg2: i32, %arg3: i32) -> (i32, i32, i32, i32) {
    %c0_i32 = arith.constant 0 : i32
    %c0_i32_0 = arith.constant 0 : i32
    return %arg1, %arg0, %arg2, %c0_i32 : i32, i32, i32, i32
  }
}

</mosaic_0001>

<bundles_post_ra>
// kernel: tpu_custom_call.1
= control target key start
LH: loop header
LB: loop body
LE: loop exit
PB: predicated region body
PF: predicated region fallthrough
CT: control target
= control target key end

     0   :  { %8 = vsyncpa [#allocation3], 0  ;;  %s1054_s0 = inlined_call_operand.hbm [shape: f32[2,8,32], index: 0, kind: input, shape index: {}]   ;;  %s1055_s1 = inlined_call_operand.hbm [shape: f32[32,32], index: 1, kind: input, shape index: {}]   ;;  %s1056_s2 = inlined_call_operand.vmem [shape: f32[1,32], index: 2, kind: input, shape index: {}]   ;;  %s1057_s3 = inlined_call_operand.hbm [shape: f32[2,4,8,8], index: 3, kind: output, shape index: {}]  }
   0x1   :  { %10 = vsyncpa [#allocation3 + $0x1], 0 }
   0x2   :  { %11 = vsyncpa [#allocation6], 0 }
   0x3   :  { %12 = vsyncpa [#allocation4], 0 }
   0x4   :  { %14 = vsyncpa [#allocation4 + $0x1], 0  ;;  %s830_s12 = smov 0   ;;  %s832_s13 = smov 0  }
   0x5   :  { %s834_s14 = smov 0   ;;  %s836_s15 = smov 0  }
   0x6   :  { %s838_s16 = smov 0   ;;  %s840_s17 = smov 0  }
   0x7 LB: > { %s517_s18 = sadd.s32 4294967295, %s795_s17   ;;  %s518_s19 = sadd.s32 4294967294, %s795_s17   ;;  %s795_s17 = sphi %s840_s17, %s20_s17   ;;  %s791_s16 = sphi %s838_s16, %s1081_s16   ;;  %s787_s15 = sphi %s836_s15, %s1080_s15   ;;  %s783_s14 = sphi %s834_s14, %s1079_s14   ;;  %s779_s13 = sphi %s832_s13, %s1078_s13   ;;  %s775_s12 = sphi %s830_s12, %s1077_s12  }
   0x8   : > { %p70_p0 = scmp.ne.s32.totalorder %s779_s13, %s775_s12  ;;  %p864_p1 = scmp.eq.s32.totalorder %s517_s18, 0 }
   0x9   : > { %p868_p2 = scmp.eq.s32.totalorder %s517_s18, 1  ;;  %p158_p3 = scmp.eq.s32.totalorder %s518_s19, 1 }
   0xa   : > { %s1062_s20 = scalar_select %p864_p1, 1, 0 }
   0xb   : > { %s1063_s21 = scalar_select %p868_p2, 1, 0 }
   0xc   : > { %p874_p4 = por %p864_p1, %p70_p0  ;;  %p519_p5 = scmp.ge.s32.totalorder %s795_s17, 1 }
   0xd   : > { %p879_p6 = por %p158_p3, %p70_p0  ;;  %p165_p7 = scmp.lt.s32.totalorder %s795_s17, 3 }
   0xe   : > { %s1064_s22 = scalar_select %p874_p4, 1, 0 }
   0xf   : > { %s1065_s23 = scalar_select %p879_p6, 1, 0 }
  0x10   : > { %p884_p8 = pnand %p519_p5, %p165_p7  ;;  %s797_s25 = smov [#allocation5]  }
  0x11   : > { %s181_s26 = sshll.u32 %s797_s25, 4  ;;  %s42_s28 = sadd.s32 1, %s791_s16  ;;  %s182_s26 = int_to_ptr.vmem [resolvable:$true] %s181_s26 }
  0x12   : > { %s1066_s24 = scalar_select %p884_p8, 1, 0 }
  0x13   : > { %p576_p9 = pneg %p884_p8  ;;  %s651_s4 = scalar_lea.hbm %s1055_s1, 512 }
  0x14   : > { %p652_p12 = scmp.ne.s32.totalorder %s1055_s1, %s651_s4  ;;  %p658_p5 = scmp.lt.u32.totalorder %s651_s4, %s1055_s1 }
  0x15   : > { %p893_p11 = pnand %p576_p9, %p864_p1 }
  0x17   : > { %p653_p13 = pneg %p893_p11 }
  0x19   : > { %p654_p0 = pnand %p653_p13, %p652_p12 }
  0x1b   : > { %p655_p3 = pneg %p654_p0 }
  0x1d   : > { %p660_p7 = pnand %p658_p5, %p655_p3 }
  0x1f   : > { %663 = shalt.err (!%p660_p7)
}
  0x20   : > { %s664_s9 = scalar_lea.vmem %s182_s26, 512  ;;  %p672_p1 = scmp.lt.s32.totalorder %s182_s26, %s182_s26 }
  0x21   : > { %p665_p9 = scmp.ne.s32.totalorder %s182_s26, %s664_s9  ;;  %p673_p4 = scmp.lt.s32.totalorder %s664_s9, %s664_s9 }
  0x23   : > { %p667_p10 = pnand %p665_p9, %p653_p13  ;;  %p674_p8 = por %p673_p4, %p672_p1 }
  0x25   : > { %p668_p6 = pneg %p667_p10 }
  0x27   : > { %p675_p2 = pnand %p674_p8, %p668_p6 }
  0x29   : > { %678 = shalt.err (!%p675_p2)
}
  0x2a   : > { %s798_s10 = smov 128   ;;  %s799_s11 = smov 8  }
  0x2b   : > { %579 = dma.hbm_to_vmem [thread:$0]  (!%p893_p11), %s1055_s1, 512, %s182_s26, [#allocation6], %s798_s10, %s798_s10, %s799_s11  }
  0x2c   : > { %p44_p1 = scmp.ge.s32.totalorder %s42_s28, 2  ;;  %s57_s25 = sadd.s32 1, %s783_s14 }
  0x2d   : > { %p64_p2 = scmp.ne.s32.totalorder %s783_s14, %s779_s13  ;;  %p65_p4 = scmp.eq.s32.totalorder %s795_s17, 0 }
  0x2e   : > { %s1083_s28 = smov (%p44_p1, %s42_s28), 0  ;;  %p1069_p8 = scmp.ne.s32.totalorder %s1063_s21, 0 }
  0x2f   : > { %p920_p6 = por %p65_p4, %p64_p2  ;;  %s50_s27 = ssub.s32 %s791_s16, %s1083_s28 }
  0x30   : > { %p926_p10 = por %p1069_p8, %p64_p2  ;;  %p589_p12 = scmp.lt.s32.totalorder %s795_s17, 2 }
  0x31   : > { %p55_p11 = scmp.eq.s32.totalorder %s50_s27, 0  ;;  %s201_s26 = sand.u32 1, %s783_s14  }
  0x32   : > { %s523_s4 = sshll.u32 %s201_s26, 3  ;;  %s524_s6 = sshll.u32 %s791_s16, 7 }
  0x33   : > { %s935_s5 = scalar_select %p55_p11, %s783_s14, %s57_s25  }
  0x34   : > { %s941_s9 = scalar_lea.hbm %s1054_s0, %s524_s6  ;;  %s205_s21 = scalar_lea.vmem [#allocation2], %s523_s4 }
  0x35   : > { %s214_s10 = sshll.u32 %s205_s21, 4  ;;  %p947_p13 = pnand %p589_p12, %p920_p6  ;;  %s943_s10 = int_to_ptr.vmem [resolvable:$true] %s214_s10 }
  0x36   : > { %s202_s18 = scalar_lea.sflag [#allocation3], %s201_s26  ;;  %s679_s19 = scalar_lea.hbm %s941_s9, 128 }
  0x37   : > { %p680_p0 = scmp.ne.s32.totalorder %s941_s9, %s679_s19  ;;  %p681_p3 = pneg %p947_p13 }
  0x38   : > { %s684_s4 = scalar_lea.hbm %s1054_s0, 256  ;;  %p685_p9 = scmp.lt.u32.totalorder %s941_s9, %s1054_s0 }
  0x39   : > { %p682_p5 = pnand %p681_p3, %p680_p0  ;;  %p686_p1 = scmp.lt.u32.totalorder %s684_s4, %s679_s19 }
  0x3a   : > { %p688_p4 = scmp.lt.u32.totalorder %s679_s19, %s941_s9 }
  0x3b   : > { %p683_p7 = pneg %p682_p5  ;;  %p687_p2 = por %p686_p1, %p685_p9 }
  0x3d   : > { %p689_p6 = por %p688_p4, %p687_p2 }
  0x3f   : > { %p690_p8 = pnand %p689_p6, %p683_p7 }
  0x41   : > { %693 = shalt.err (!%p690_p8)
}
  0x42   : > { %s694_s26 = scalar_lea.vmem %s943_s10, 128  ;;  %s800_s7 = smov [#allocation2]  }
  0x43   : > { %p695_p12 = scmp.ne.s32.totalorder %s943_s10, %s694_s26  ;;  %s699_s8 = sshll.u32 %s800_s7, 4  ;;  %s700_s8 = int_to_ptr.vmem [resolvable:$false] %s699_s8 }
  0x44   : > { %s701_s21 = scalar_lea.vmem %s700_s8, 256  ;;  %p702_p5 = scmp.lt.s32.totalorder %s943_s10, %s700_s8 }
  0x45   : > { %p697_p11 = pnand %p695_p12, %p681_p3  ;;  %p703_p9 = scmp.lt.s32.totalorder %s701_s21, %s694_s26 }
  0x47   : > { %p698_p0 = pneg %p697_p11  ;;  %p704_p1 = por %p703_p9, %p702_p5 }
  0x49   : > { %p705_p2 = pnand %p704_p1, %p698_p0 }
  0x4b   : > { %708 = shalt.err (!%p705_p2)
}
  0x4c   : > { %583 = dma.hbm_to_vmem [thread:$0]  (!%p947_p13), %s941_s9, 128, %s943_s10, %s202_s18  }
  0x4d   : > { %p1072_p7 = scmp.ne.s32.totalorder %s1066_s24, 0 }
  0x4e   : > { %s979_s19 = sand.u32 (!%p1072_p7), 1, %s779_s13   ;;  %p1073_p3 = scmp.ne.s32.totalorder (!%p1072_p7), %s1064_s22, 0 }
  0x4f   : > { %223 = sbr.rel (%p1072_p7) target bundleno = 457 (0x1c9), region = 32  ;;  %s526_s25 = sshll.u32 (!%p1072_p7), %s979_s19, 3 }
  0x50   : > { %s226_s27 = scalar_lea.sflag (!%p1072_p7), [#allocation3], %s979_s19  ;;  %s229_s4 = scalar_lea.vmem (!%p1072_p7), [#allocation2], %s526_s25 }
  0x56   : > { %762 = dma.done.wait (%p1073_p3), %s226_s27, 128  }
  0x57   : > { %764 = vsyncadd (%p1073_p3), %s226_s27, 4294967168  ;;  %p1074_p4 = scmp.ne.s32.totalorder %s1062_s20, 0 }
  0x59   : > { %766 = dma.done.wait (%p1074_p4), [#allocation6], 512  }
  0x5a   : > { %768 = vsyncadd (%p1074_p4), [#allocation6], 4294966784  ;;  %v801_v0 = vmov 0.0|0.0   ;;  %vm802_vm0 = vmmov 0   ;;  %v803_v1 = vmov 0.0   ;;  %vm269_vm1 = vcmask 261120  }
  0x5b   : > { %560 = vmatprep.subr.bf16.mxu0 %v801_v0  ;;  %557 = vmatprep.mubr.msk.f32.mxu0 %vm802_vm0, %v803_v1  ;;  %v265_v2 = vld [vmem:[#allocation5] sm:$0xff]  ;;  %v266_v3 = vld [vmem:[#allocation5 + $0x8] sm:$0xff]  ;;  %vm562_vm2 = vmpackc.low %vm269_vm1, %vm269_vm1  ;;  %s528_s20 = sshll.u32 %s979_s19, 5  ;;  %vm363_vm3 = vcmask 64512   ;;  %s804_s9 = smov 104  }
  0x5c   : > { %v561_v4 = vpack.c.bf16 %v266_v3, %v265_v2  ;;  %v267_v5 = vld [vmem:[#allocation5 + $0x10] sm:$0xff]  ;;  %v268_v6 = vld [vmem:[#allocation5 + $0x18] sm:$0xff]  ;;  %s805_s10 = smov 120   ;;  %s258_s11 = scalar_lea.vmem [#allocation7], %s528_s20 }
  0x5d   : > { %v565_v7 = vpack.c.bf16 %v268_v6, %v267_v5  ;;  %v264_v8 = vld [vmem:[%s229_s4] sm:$0xff]  ;;  %s806_s18 = smov 112   ;;  %s398_s29 = sshll.u32 %s258_s11, 4  ;;  %s997_s29 = int_to_ptr.vmem [resolvable:$true] %s398_s29 }
  0x5e   : > { %563 = vmatpush3.bf16.xpose.msk.msra.mxu0 %vm562_vm2, %v561_v4  ;;  %v534_v9 = vld [vmem:[%s1056_s2] ss:$0 sm:$0xff]  ;;  %s543_s6 = sshll.u32 %s787_s15, 9  ;;  %s382_s15 = scalar_lea.sflag [#allocation4], %s979_s19 }
  0x5f   : > { %564 = vmatprep.subr.bf16.mxu0 %v801_v0  ;;  %s1004_s8 = scalar_lea.hbm %s1057_s3, %s543_s6  ;;  %s709_s21 = scalar_lea.vmem %s997_s29, 512 }
  0x60   : > { %p710_p13 = scmp.ne.s32.totalorder %s997_s29, %s709_s21  ;;  %s807_s25 = smov [#allocation7]  }
  0x61   : > { %s713_s27 = sshll.u32 %s807_s25, 4  ;;  %s714_s27 = int_to_ptr.vmem [resolvable:$false] %s713_s27 }
  0x62   : > { %p711_p6 = pnand %p710_p13, %p926_p10  ;;  %s715_s4 = scalar_lea.vmem %s714_s27, 1024 }
  0x63   : > { %p716_p12 = scmp.lt.s32.totalorder %s997_s29, %s714_s27  ;;  %p717_p11 = scmp.lt.s32.totalorder %s715_s4, %s709_s21 }
  0x64   : > { %p712_p8 = pneg %p711_p6 }
  0x65   : > { %p718_p0 = por %p717_p11, %p716_p12 }
  0x66   : > { %567 = vmatpush3.bf16.xpose.msk.msra.mxu0 %vm562_vm2, %v565_v7 }
  0x67   : > { %p719_p5 = pnand %p718_p0, %p712_p8 }
  0x6d   : > { %558 = vmatmul.mubr.msk.f32.vlgmr.msra.gmra.mrb[0].mxu0 %vm269_vm1, %v264_v8 }
 0x140   : > { %v351_v10 = vpop.f32.mrb[0].mxu0 }
 0x141   : > { %v362_v11 = vadd.f32 %v534_v9, %v351_v10  ;;  %v559_v12 = vpop.f32.mrb[1].mxu0 }
 0x143   : > { %376 = vrot.lane.b32.xlu1 %v362_v11, %s804_s9  ;;  %366 = vrot.lane.b32.xlu0 %v362_v11, %s805_s10  ;;  %364 = vst.msk [vmem:[%s258_s11] sm:$0xff] %vm363_vm3, %v362_v11 }
 0x147   : > { %371 = vrot.lane.b32.xlu0 %v362_v11, %s806_s18 }
 0x1b5   : > { %v377_v13 = vpop.permute.xlu1 %376  ;;  %v367_v14 = vpop.permute.xlu0 %366 }
 0x1b6   : > { %537 = vst.msk [vmem:[%s258_s11 + $0x18] sm:$0xff] %vm363_vm3, %v377_v13  ;;  %535 = vst.msk [vmem:[%s258_s11 + $0x8] sm:$0xff] %vm363_vm3, %v367_v14 }
 0x1b9   : > { %v372_v15 = vpop.permute.xlu0 %371 }
 0x1ba   : > { %536 = vst.msk [vmem:[%s258_s11 + $0x10] sm:$0xff] %vm363_vm3, %v372_v15 }
 0x1bb   : > { %722 = shalt.err (!%p719_p5)
}
 0x1bc   : > { %s723_s20 = scalar_lea.hbm %s1004_s8, 512  ;;  %s727_s9 = scalar_lea.hbm %s1057_s3, 1024 }
 0x1bd   : > { %p724_p9 = scmp.ne.s32.totalorder %s1004_s8, %s723_s20  ;;  %p728_p7 = scmp.lt.u32.totalorder %s1004_s8, %s1057_s3 }
 0x1be   : > { %p729_p3 = scmp.lt.u32.totalorder %s727_s9, %s723_s20  ;;  %p731_p13 = scmp.lt.u32.totalorder %s723_s20, %s1004_s8 }
 0x1bf   : > { %p725_p1 = pnand %p724_p9, %p926_p10 }
 0x1c0   : > { %p730_p4 = por %p729_p3, %p728_p7 }
 0x1c1   : > { %p726_p2 = pneg %p725_p1 }
 0x1c2   : > { %p732_p6 = por %p731_p13, %p730_p4 }
 0x1c4   : > { %p733_p8 = pnand %p732_p6, %p726_p2 }
 0x1c6   : > { %736 = shalt.err (!%p733_p8)
}
 0x1c7   : > { %s808_s18 = smov 128   ;;  %s809_s6 = smov 8  }
 0x1c8   : > { %574 = dma.vmem_to_hbm [thread:$0]  (%p926_p10), %s997_s29, 512, %s1004_s8, %s382_s15, %s808_s18, %s808_s18, %s809_s6  }
 0x1c9 PF: > { %s413_s26 = sand.u32 1, %s775_s12   ;;  %p1075_p12 = scmp.ne.s32.totalorder %s1065_s23, 0 }
 0x1ca   : > { %p1076_p11 = scmp.ge.s32.totalorder %s795_s17, 2  ;;  %s414_s7 = scalar_lea.sflag [#allocation4], %s413_s26 }
 0x1cc   : > { %p585_p0 = pnand %p1076_p11, %p1075_p12 }
 0x1ce   : > { %770 = dma.done.wait (!%p585_p0), %s414_s7, 512  }
 0x1cf   : > { %772 = vsyncadd (!%p585_p0), %s414_s7, 4294966784  ;;  %s20_s17 = sadd.s32 1, %s795_s17   ;;  %s1077_s12 = smov %s779_s13 }
 0x1d0   : > { %p17_p5 = scmp.ge.s32.totalorder %s20_s17, 4   ;;  %s1078_s13 = smov %s783_s14 }
 0x1d1   : > { %s1079_s14 = smov %s935_s5  ;;  %s1080_s15 = smov %s791_s16 }
 0x1d2   : > { %s1081_s16 = smov %s1083_s28  ;;  %19 = sbr.rel (!%p17_p5) target bundleno = 7 (0x7), region = 88 }
 0x1d9   :  { %419 = vsyncpa [#allocation3], 1 }
 0x1da   :  { %421 = vsyncpa [#allocation3 + $0x1], 1 }
 0x1db   :  { %422 = vsyncpa [#allocation6], 1 }
 0x1dc   :  { %423 = vsyncpa [#allocation4], 1 }
 0x1dd   :  { %425 = vsyncpa [#allocation4 + $0x1], 1 }

</bundles_post_ra>
